<compile_context>
chip_gen: v5e
topology: v5e:2x2
jax: 0.10.0
libtpu: 0.0.40
codegen_flags: <defaults>
</compile_context>

<pallas_src>
import math

import jax
import jax.numpy as jnp
from jax import lax
from jax.experimental import pallas as pl
from jax.experimental.pallas import tpu as pltpu


def _make_kernel(seq_len, n_layers):
    """Kernel over one block of RB = BG*seq_len packed rows, LW lanes."""

    def kernel(x_ref, w_ref, b_ref, out_ref):
        h = x_ref[...].astype(jnp.float32)                  # (RB, LW)
        rb, lw = h.shape

        # Rows are (group, l) ordered with l fastest and RB % seq_len == 0, so
        # every wrap-around row produced by the rolls below lands on an l == 0
        # (resp. l == L-1) row and is zeroed by keep_m1 / keep_p1.
        pos = lax.broadcasted_iota(jnp.int32, (rb, lw), 0) % seq_len
        keep_m1 = (pos != 0).astype(jnp.float32)             # x[l-1] exists
        keep_p1 = (pos != seq_len - 1).astype(jnp.float32)   # x[l+1] exists

        for i in range(n_layers):
            # Shifted taps via XLU roll + multiplicative boundary mask.
            h_m1 = pltpu.roll(h, 1, axis=0) * keep_m1        # x[l-1]
            h_p1 = pltpu.roll(h, rb - 1, axis=0) * keep_p1   # x[l+1]
            # One fused MXU matmul per layer: (RB, 3*LW) bf16 @ (3*LW, LW) bf16
            # with f32 accumulation (weight is block-diagonal per lane slot).
            hcat = jnp.concatenate(
                [h_m1.astype(jnp.bfloat16),
                 h.astype(jnp.bfloat16),
                 h_p1.astype(jnp.bfloat16)], axis=-1)
            y = jnp.dot(hcat, w_ref[i], preferred_element_type=jnp.float32)
            y = y + b_ref[i]
            h = jnp.maximum(y, 0.0) if i < n_layers - 1 else y

        out_ref[...] = h.astype(out_ref.dtype)               # full 128-lane store

    return kernel


def cnn_autoencoder(x, params, rows_target=4096):
    """x: (B, L, C) float32.  params: list of (W (Cout, Cin, 3), b (Cout,)).

    Returns (B, L, Cout_last) float32.
    """
    B, L, C = x.shape
    n_layers = len(params)
    c_out = params[-1][0].shape[0]

    # ---- padded channel width CP (multiple of 8) and lane-packing factor ----
    cmax = max([C, c_out] + [w.shape[0] for w, _ in params]
                          + [w.shape[1] for w, _ in params])
    CP = -(-max(8, cmax) // 8) * 8
    G = 128 // CP if 128 % CP == 0 else 1      # sequences packed per lane row
    LW = G * CP                                 # lane width of packed rows

    # ---- pack weights: block-diagonal (3*LW, LW) bf16 per layer -------------
    w_all = jnp.zeros((n_layers, 3 * LW, LW), jnp.float32)
    b_all = jnp.zeros((n_layers, 1, LW), jnp.float32)
    eye_g = jnp.eye(G, dtype=jnp.float32)
    for i, (w, b) in enumerate(params):
        cout, cin, _k = w.shape
        wt = jnp.transpose(w, (2, 1, 0)).astype(jnp.float32)        # (3, Cin, Cout)
        blk = jnp.zeros((3, CP, CP), jnp.float32).at[:, :cin, :cout].set(wt)
        wbd = jnp.concatenate([jnp.kron(eye_g, blk[t]) for t in range(3)], axis=0)
        w_all = w_all.at[i].set(wbd)                                  # (3*LW, LW)
        bp = jnp.zeros((CP,), jnp.float32).at[:cout].set(b.astype(jnp.float32))
        b_all = b_all.at[i, 0].set(jnp.tile(bp, G))
    w_all = w_all.astype(jnp.bfloat16)            # MXU operands are bf16

    # ---- row blocking: BG sequence-groups per grid step, RB = BG*L rows -----
    m = 16 // math.gcd(L, 16)                     # bf16 input tile: RB % 16 == 0
    n_groups = -(-B // G)                         # groups of G sequences
    bg_target = max(1, rows_target // L)
    bytes_per_row = LW * 40                       # in/out double-buffers + temps
    vmem_budget = 40 * 1024 * 1024                # fits v5e/v6e and v7x (64 MiB)
    bg_target = min(bg_target, max(1, vmem_budget // (bytes_per_row * L)))
    if n_groups >= 2 * m:                         # keep >=2 grid steps (v7x 2 TCs)
        bg_target = min(bg_target, n_groups // 2)
    bg = max(m, (bg_target // m) * m)
    bg = min(bg, -(-n_groups // m) * m)
    n_groups_pad = -(-n_groups // bg) * bg
    B_pad = n_groups_pad * G
    RB = bg * L
    assert RB % L == 0, "block must hold whole sequences (roll-wrap masking)"

    # ---- pack input: (B, L, C) -> (n_groups_pad*L, LW) bf16 -----------------
    xp = x.astype(jnp.float32)
    if CP > C:
        xp = jnp.pad(xp, ((0, 0), (0, 0), (0, CP - C)))
    if B_pad > B:
        xp = jnp.pad(xp, ((0, B_pad - B), (0, 0), (0, 0)))
    x2d = (xp.reshape(n_groups_pad, G, L, CP)
             .transpose(0, 2, 1, 3)
             .reshape(n_groups_pad * L, LW)
             .astype(jnp.bfloat16))

    n_rows = n_groups_pad * L
    est_vmem = RB * bytes_per_row + 2 * (w_all.size * 2 + b_all.size * 4) + (1 << 20)
    vmem_limit = int(min(60 * 1024 * 1024, max(32 * 1024 * 1024, est_vmem)))
    cost = pl.CostEstimate(
        flops=2 * n_rows * n_layers * (3 * LW) * LW,
        transcendentals=0,
        bytes_accessed=x2d.size * 2 + n_rows * LW * 4
        + w_all.size * 2 + b_all.size * 4)

    kernel = _make_kernel(L, n_layers)

    out2d = pl.pallas_call(
        kernel,
        out_shape=jax.ShapeDtypeStruct((n_rows, LW), jnp.float32),
        grid_spec=pltpu.PrefetchScalarGridSpec(
            num_scalar_prefetch=0,
            grid=(n_groups_pad // bg,),
            in_specs=[
                pl.BlockSpec((RB, LW), lambda g: (g, 0)),
                pl.BlockSpec((n_layers, 3 * LW, LW), lambda g: (0, 0, 0)),
                pl.BlockSpec((n_layers, 1, LW), lambda g: (0, 0, 0)),
            ],
            out_specs=pl.BlockSpec((RB, LW), lambda g: (g, 0)),
        ),
        compiler_params=pltpu.CompilerParams(
            dimension_semantics=("parallel",),
            vmem_limit_bytes=vmem_limit),
        cost_estimate=cost,
    )(x2d, w_all, b_all)

    # ---- unpack: (n_groups_pad*L, LW) -> (B, L, c_out) ----------------------
    # TODO(synk): on v5e a bf16 output slab would halve writeback bytes; kept
    # f32 to preserve the module's f32 output dtype.
    out = (out2d.reshape(n_groups_pad, L, G, CP)
                .transpose(0, 2, 1, 3)
                .reshape(B_pad, L, CP))
    return out[:B, :, :c_out]


# ---------------- pure-JAX reference (for correctness check) ----------------
def _conv1d_ncl(x_ncl, w, b):
    # x_ncl: (B, Cin, L); w: (Cout, Cin, 3); b: (Cout,)
    y = lax.conv_general_dilated(
        x_ncl, w, window_strides=(1,), padding=[(1, 1)],
        dimension_numbers=("NCH", "OIH", "NCH"))
    return y + b[None, :, None]


def reference_forward(x, params, emulate_bf16_operands=False):
    """Reference forward.  With emulate_bf16_operands=True it reproduces the
    kernel's numerics (matmul operands rounded to bf16, f32 accumulation and
    f32 bias/ReLU); remaining differences are f32 accumulation order only."""
    def rnd(a):
        a = a.astype(jnp.float32)
        if emulate_bf16_operands:
            a = a.astype(jnp.bfloat16).astype(jnp.float32)
        return a

    h = jnp.transpose(x, (0, 2, 1)).astype(jnp.float32)      # (B, C, L)
    n = len(params)
    for i, (w, b) in enumerate(params):
        y = _conv1d_ncl(rnd(h), rnd(w), b.astype(jnp.float32))
        h = jnp.maximum(y, 0.0) if i < n - 1 else y
    return jnp.transpose(h, (0, 2, 1))                        # (B, L, C)


def init_params(key, input_dim):
    shapes = [
        ((16, input_dim, 3), (16,)),
        ((8, 16, 3), (8,)),
        ((16, 8, 3), (16,)),
        ((input_dim, 16, 3), (input_dim,)),
    ]
    params = []
    for (ws, bs) in shapes:
        key, kw, kb = jax.random.split(key, 3)
        fan_in = ws[1] * ws[2]
        bound = 1.0 / jnp.sqrt(fan_in)
        w = jax.random.uniform(kw, ws, jnp.float32, -bound, bound)
        b = jax.random.uniform(kb, bs, jnp.float32, -bound, bound)
        params.append((w, b))
    return params


if __name__ == "__main__":
    key = jax.random.PRNGKey(0)
    kx, kp = jax.random.split(key)

    B, L, input_dim = 2, 16, 4
    x = jax.random.normal(kx, (B, L, input_dim), jnp.float32)
    params = init_params(kp, input_dim)

    out = jax.block_until_ready(cnn_autoencoder(x, params))
    assert out.shape == (B, L, input_dim)

    # Kernel uses bf16 MXU operands (f32 accumulation), so compare against the
    # reference with matching operand rounding (per perf-review tolerance note).
    ref = jax.block_until_ready(
        reference_forward(x, params, emulate_bf16_operands=True))
    assert jnp.allclose(out, ref, atol=5e-3, rtol=5e-3), (
        f"max abs err {jnp.max(jnp.abs(out - ref))}")

    print("KERNEL_OK")
</pallas_src>

<mosaic_0001>
module attributes {stable_mosaic.version = 11 : i64} {
  func.func @kernel(%arg0: i32, %arg1: memref<16x128xbf16, #tpu.memory_space<vmem>>, %arg2: memref<4x384x128xbf16, #tpu.memory_space<vmem>>, %arg3: memref<4x1x128xf32, #tpu.memory_space<vmem>>, %arg4: memref<16x128xf32, #tpu.memory_space<vmem>>) attributes {dimension_semantics = [#tpu.dimension_semantics<parallel>], iteration_bounds = array<i64: 1>, scalar_prefetch = 0 : i64, scratch_operands = 0 : i64, tpu.core_type = #tpu.core_type<tc>, window_params = [{transform_indices = @transform_0, window_bounds = array<i64: 16, 128>}, {pipeline_mode = #tpu.pipeline_mode<synchronous>, transform_indices = @transform_1, window_bounds = array<i64: 4, 384, 128>}, {pipeline_mode = #tpu.pipeline_mode<synchronous>, transform_indices = @transform_2, window_bounds = array<i64: 4, 1, 128>}, {transform_indices = @transform_3, window_bounds = array<i64: 16, 128>}]} {
    %c0 = arith.constant 0 : index
    %c0_0 = arith.constant 0 : index
    %0 = vector.load %arg1[%c0, %c0_0] : memref<16x128xbf16, #tpu.memory_space<vmem>>, vector<16x128xbf16>
    %1 = arith.extf %0 : vector<16x128xbf16> to vector<16x128xf32>
    %2 = tpu.iota {dimensions = array<i32: 0>} : vector<16x128xi32>
    %c16_i32 = arith.constant 16 : i32
    %c0_i32 = arith.constant 0 : i32
    %3 = arith.cmpi eq, %c16_i32, %c0_i32 : i32
    %c1_i32 = arith.constant 1 : i32
    %4 = arith.select %3, %c1_i32, %c16_i32 : i32
    %5 = vector.broadcast %4 : i32 to vector<16x128xi32>
    %6 = arith.remsi %2, %5 : vector<16x128xi32>
    %c0_i32_1 = arith.constant 0 : i32
    %7 = vector.broadcast %c0_i32_1 : i32 to vector<16x128xi32>
    %8 = arith.cmpi ne, %6, %7 : vector<16x128xi32>
    %c0_i32_2 = arith.constant 0 : i32
    %9 = vector.broadcast %c0_i32_2 : i32 to vector<16x128xi32>
    %10 = arith.cmpi slt, %6, %9 : vector<16x128xi32>
    %c0_i32_3 = arith.constant 0 : i32
    %11 = arith.cmpi slt, %4, %c0_i32_3 : i32
    %12 = vector.broadcast %11 : i1 to vector<16x128xi1>
    %13 = vector.broadcast %12 : vector<16x128xi1> to vector<16x128xi1>
    %14 = arith.xori %10, %13 : vector<16x128xi1>
    %15 = arith.andi %14, %8 : vector<16x128xi1>
    %16 = vector.broadcast %4 : i32 to vector<16x128xi32>
    %17 = arith.addi %6, %16 : vector<16x128xi32>
    %18 = arith.select %15, %17, %6 : vector<16x128xi1>, vector<16x128xi32>
    %c0_i32_4 = arith.constant 0 : i32
    %19 = vector.broadcast %c0_i32_4 : i32 to vector<16x128xi32>
    %20 = arith.cmpi ne, %18, %19 : vector<16x128xi32>
    %21 = arith.extui %20 : vector<16x128xi1> to vector<16x128xi32>
    %22 = arith.sitofp %21 : vector<16x128xi32> to vector<16x128xf32>
    %c15_i32 = arith.constant 15 : i32
    %23 = vector.broadcast %c15_i32 : i32 to vector<16x128xi32>
    %24 = arith.cmpi ne, %18, %23 : vector<16x128xi32>
    %25 = arith.extui %24 : vector<16x128xi1> to vector<16x128xi32>
    %26 = arith.sitofp %25 : vector<16x128xi32> to vector<16x128xf32>
    %c1_i32_5 = arith.constant 1 : i32
    %27 = tpu.dynamic_rotate %1 by %c1_i32_5 dim 0 : vector<16x128xf32>, i32 -> vector<16x128xf32>
    %28 = arith.mulf %27, %22 : vector<16x128xf32>
    %c15_i32_6 = arith.constant 15 : i32
    %29 = tpu.dynamic_rotate %1 by %c15_i32_6 dim 0 : vector<16x128xf32>, i32 -> vector<16x128xf32>
    %30 = arith.mulf %29, %26 : vector<16x128xf32>
    %31 = arith.truncf %28 : vector<16x128xf32> to vector<16x128xbf16>
    %32 = arith.truncf %1 : vector<16x128xf32> to vector<16x128xbf16>
    %33 = arith.truncf %30 : vector<16x128xf32> to vector<16x128xbf16>
    %34 = tpu.concatenate %31, %32, %33 in 1 : vector<16x128xbf16>, vector<16x128xbf16>, vector<16x128xbf16> -> vector<16x384xbf16>
    %c0_7 = arith.constant 0 : index
    %c0_8 = arith.constant 0 : index
    %c0_9 = arith.constant 0 : index
    %35 = vector.load %arg2[%c0_7, %c0_8, %c0_9] : memref<4x384x128xbf16, #tpu.memory_space<vmem>>, vector<1x384x128xbf16>
    %36 = vector.shape_cast %35 : vector<1x384x128xbf16> to vector<384x128xbf16>
    %cst = arith.constant dense<0.000000e+00> : vector<16x128xf32>
    %37 = tpu.matmul %34, %36, %cst {dimension_numbers = #tpu.dot_dimension_numbers<[1], [0], [0], [1], [0, 0, 1, 1], [], []>} : vector<16x384xbf16>, vector<384x128xbf16>, vector<16x128xf32> -> vector<16x128xf32>
    %c0_10 = arith.constant 0 : index
    %c0_11 = arith.constant 0 : index
    %c0_12 = arith.constant 0 : index
    %38 = vector.load %arg3[%c0_10, %c0_11, %c0_12] : memref<4x1x128xf32, #tpu.memory_space<vmem>>, vector<1x1x128xf32>
    %39 = vector.shape_cast %38 : vector<1x1x128xf32> to vector<1x128xf32>
    %40 = vector.broadcast %39 : vector<1x128xf32> to vector<16x128xf32>
    %41 = arith.addf %37, %40 : vector<16x128xf32>
    %cst_13 = arith.constant 0.000000e+00 : f32
    %42 = vector.broadcast %cst_13 : f32 to vector<16x128xf32>
    %43 = arith.maximumf %41, %42 : vector<16x128xf32>
    %c1_i32_14 = arith.constant 1 : i32
    %44 = tpu.dynamic_rotate %43 by %c1_i32_14 dim 0 : vector<16x128xf32>, i32 -> vector<16x128xf32>
    %45 = arith.mulf %44, %22 : vector<16x128xf32>
    %c15_i32_15 = arith.constant 15 : i32
    %46 = tpu.dynamic_rotate %43 by %c15_i32_15 dim 0 : vector<16x128xf32>, i32 -> vector<16x128xf32>
    %47 = arith.mulf %46, %26 : vector<16x128xf32>
    %48 = arith.truncf %45 : vector<16x128xf32> to vector<16x128xbf16>
    %49 = arith.truncf %43 : vector<16x128xf32> to vector<16x128xbf16>
    %50 = arith.truncf %47 : vector<16x128xf32> to vector<16x128xbf16>
    %51 = tpu.concatenate %48, %49, %50 in 1 : vector<16x128xbf16>, vector<16x128xbf16>, vector<16x128xbf16> -> vector<16x384xbf16>
    %c1 = arith.constant 1 : index
    %c0_16 = arith.constant 0 : index
    %c0_17 = arith.constant 0 : index
    %52 = vector.load %arg2[%c1, %c0_16, %c0_17] : memref<4x384x128xbf16, #tpu.memory_space<vmem>>, vector<1x384x128xbf16>
    %53 = vector.shape_cast %52 : vector<1x384x128xbf16> to vector<384x128xbf16>
    %cst_18 = arith.constant dense<0.000000e+00> : vector<16x128xf32>
    %54 = tpu.matmul %51, %53, %cst_18 {dimension_numbers = #tpu.dot_dimension_numbers<[1], [0], [0], [1], [0, 0, 1, 1], [], []>} : vector<16x384xbf16>, vector<384x128xbf16>, vector<16x128xf32> -> vector<16x128xf32>
    %c1_19 = arith.constant 1 : index
    %c0_20 = arith.constant 0 : index
    %c0_21 = arith.constant 0 : index
    %55 = vector.load %arg3[%c1_19, %c0_20, %c0_21] : memref<4x1x128xf32, #tpu.memory_space<vmem>>, vector<1x1x128xf32>
    %56 = vector.shape_cast %55 : vector<1x1x128xf32> to vector<1x128xf32>
    %57 = vector.broadcast %56 : vector<1x128xf32> to vector<16x128xf32>
    %58 = arith.addf %54, %57 : vector<16x128xf32>
    %cst_22 = arith.constant 0.000000e+00 : f32
    %59 = vector.broadcast %cst_22 : f32 to vector<16x128xf32>
    %60 = arith.maximumf %58, %59 : vector<16x128xf32>
    %c1_i32_23 = arith.constant 1 : i32
    %61 = tpu.dynamic_rotate %60 by %c1_i32_23 dim 0 : vector<16x128xf32>, i32 -> vector<16x128xf32>
    %62 = arith.mulf %61, %22 : vector<16x128xf32>
    %c15_i32_24 = arith.constant 15 : i32
    %63 = tpu.dynamic_rotate %60 by %c15_i32_24 dim 0 : vector<16x128xf32>, i32 -> vector<16x128xf32>
    %64 = arith.mulf %63, %26 : vector<16x128xf32>
    %65 = arith.truncf %62 : vector<16x128xf32> to vector<16x128xbf16>
    %66 = arith.truncf %60 : vector<16x128xf32> to vector<16x128xbf16>
    %67 = arith.truncf %64 : vector<16x128xf32> to vector<16x128xbf16>
    %68 = tpu.concatenate %65, %66, %67 in 1 : vector<16x128xbf16>, vector<16x128xbf16>, vector<16x128xbf16> -> vector<16x384xbf16>
    %c2 = arith.constant 2 : index
    %c0_25 = arith.constant 0 : index
    %c0_26 = arith.constant 0 : index
    %69 = vector.load %arg2[%c2, %c0_25, %c0_26] : memref<4x384x128xbf16, #tpu.memory_space<vmem>>, vector<1x384x128xbf16>
    %70 = vector.shape_cast %69 : vector<1x384x128xbf16> to vector<384x128xbf16>
    %cst_27 = arith.constant dense<0.000000e+00> : vector<16x128xf32>
    %71 = tpu.matmul %68, %70, %cst_27 {dimension_numbers = #tpu.dot_dimension_numbers<[1], [0], [0], [1], [0, 0, 1, 1], [], []>} : vector<16x384xbf16>, vector<384x128xbf16>, vector<16x128xf32> -> vector<16x128xf32>
    %c2_28 = arith.constant 2 : index
    %c0_29 = arith.constant 0 : index
    %c0_30 = arith.constant 0 : index
    %72 = vector.load %arg3[%c2_28, %c0_29, %c0_30] : memref<4x1x128xf32, #tpu.memory_space<vmem>>, vector<1x1x128xf32>
    %73 = vector.shape_cast %72 : vector<1x1x128xf32> to vector<1x128xf32>
    %74 = vector.broadcast %73 : vector<1x128xf32> to vector<16x128xf32>
    %75 = arith.addf %71, %74 : vector<16x128xf32>
    %cst_31 = arith.constant 0.000000e+00 : f32
    %76 = vector.broadcast %cst_31 : f32 to vector<16x128xf32>
    %77 = arith.maximumf %75, %76 : vector<16x128xf32>
    %c1_i32_32 = arith.constant 1 : i32
    %78 = tpu.dynamic_rotate %77 by %c1_i32_32 dim 0 : vector<16x128xf32>, i32 -> vector<16x128xf32>
    %79 = arith.mulf %78, %22 : vector<16x128xf32>
    %c15_i32_33 = arith.constant 15 : i32
    %80 = tpu.dynamic_rotate %77 by %c15_i32_33 dim 0 : vector<16x128xf32>, i32 -> vector<16x128xf32>
    %81 = arith.mulf %80, %26 : vector<16x128xf32>
    %82 = arith.truncf %79 : vector<16x128xf32> to vector<16x128xbf16>
    %83 = arith.truncf %77 : vector<16x128xf32> to vector<16x128xbf16>
    %84 = arith.truncf %81 : vector<16x128xf32> to vector<16x128xbf16>
    %85 = tpu.concatenate %82, %83, %84 in 1 : vector<16x128xbf16>, vector<16x128xbf16>, vector<16x128xbf16> -> vector<16x384xbf16>
    %c3 = arith.constant 3 : index
    %c0_34 = arith.constant 0 : index
    %c0_35 = arith.constant 0 : index
    %86 = vector.load %arg2[%c3, %c0_34, %c0_35] : memref<4x384x128xbf16, #tpu.memory_space<vmem>>, vector<1x384x128xbf16>
    %87 = vector.shape_cast %86 : vector<1x384x128xbf16> to vector<384x128xbf16>
    %cst_36 = arith.constant dense<0.000000e+00> : vector<16x128xf32>
    %88 = tpu.matmul %85, %87, %cst_36 {dimension_numbers = #tpu.dot_dimension_numbers<[1], [0], [0], [1], [0, 0, 1, 1], [], []>} : vector<16x384xbf16>, vector<384x128xbf16>, vector<16x128xf32> -> vector<16x128xf32>
    %c3_37 = arith.constant 3 : index
    %c0_38 = arith.constant 0 : index
    %c0_39 = arith.constant 0 : index
    %89 = vector.load %arg3[%c3_37, %c0_38, %c0_39] : memref<4x1x128xf32, #tpu.memory_space<vmem>>, vector<1x1x128xf32>
    %90 = vector.shape_cast %89 : vector<1x1x128xf32> to vector<1x128xf32>
    %91 = vector.broadcast %90 : vector<1x128xf32> to vector<16x128xf32>
    %92 = arith.addf %88, %91 : vector<16x128xf32>
    %c0_40 = arith.constant 0 : index
    %c0_41 = arith.constant 0 : index
    %93 = vector.load %arg4[%c0_40, %c0_41] : memref<16x128xf32, #tpu.memory_space<vmem>>, vector<16x128xf32>
    tpu.vector_store %arg4[%c0_40, %c0_41], %92 {strides = array<i32>} : memref<16x128xf32, #tpu.memory_space<vmem>>, vector<16x128xf32>,
    return
  }
  func.func @transform_0(%arg0: i32) -> (i32, i32) {
    %c0_i32 = arith.constant 0 : i32
    %c0_i32_0 = arith.constant 0 : i32
    return %arg0, %c0_i32 : i32, i32
  }
  func.func @transform_1(%arg0: i32) -> (i32, i32, i32) {
    %c0_i32 = arith.constant 0 : i32
    %c0_i32_0 = arith.constant 0 : i32
    %c0_i32_1 = arith.constant 0 : i32
    %c0_i32_2 = arith.constant 0 : i32
    return %c0_i32, %c0_i32_0, %c0_i32_1 : i32, i32, i32
  }
  func.func @transform_2(%arg0: i32) -> (i32, i32, i32) {
    %c0_i32 = arith.constant 0 : i32
    %c0_i32_0 = arith.constant 0 : i32
    %c0_i32_1 = arith.constant 0 : i32
    %c0_i32_2 = arith.constant 0 : i32
    return %c0_i32, %c0_i32_0, %c0_i32_1 : i32, i32, i32
  }
  func.func @transform_3(%arg0: i32) -> (i32, i32) {
    %c0_i32 = arith.constant 0 : i32
    %c0_i32_0 = arith.constant 0 : i32
    return %arg0, %c0_i32 : i32, i32
  }
}

</mosaic_0001>

<bundles_post_ra>
// kernel: tpu_custom_call.1
= control target key start
LH: loop header
LB: loop body
LE: loop exit
PB: predicated region body
PF: predicated region fallthrough
CT: control target
= control target key end

     0   :  { %8 = vsyncpa [#allocation3], 0  ;;  %s1932_s0 = inlined_call_operand.hbm [shape: bf16[16,128], index: 0, kind: input, shape index: {}]   ;;  %s1933_s1 = inlined_call_operand.hbm [shape: bf16[4,384,128], index: 1, kind: input, shape index: {}]   ;;  %s1934_s2 = inlined_call_operand.hbm [shape: f32[4,1,128], index: 2, kind: input, shape index: {}]   ;;  %s1935_s3 = inlined_call_operand.hbm [shape: f32[16,128], index: 3, kind: output, shape index: {}]  }
   0x1   :  { %9 = vsyncpa [#allocation6], 0 }
   0x2   :  { %10 = vsyncpa [#allocation4], 0  ;;  %s28_s14 = sshll.u32 %s1933_s1, 4  ;;  %s1839_s15 = smov [#allocation5]   ;;  %s29_s14 = int_to_ptr.hbm [resolvable:$true] %s28_s14 }
   0x3   :  { %s30_s16 = sshll.u32 %s1839_s15, 4  ;;  %s15_s19 = sshll.u32 %s1932_s0, 4  ;;  %s31_s16 = int_to_ptr.vmem [resolvable:$true] %s30_s16  ;;  %s16_s19 = int_to_ptr.hbm [resolvable:$true] %s15_s19 }
   0x4   :  { %s1840_s20 = smov 64   ;;  %s1841_s21 = smov 4  }
   0x5   :  { %36 = dma.hbm_to_vmem [thread:$0]  %s29_s14, 12288, %s31_s16, [#allocation6], %s1840_s20, %s1840_s20, %s1841_s21  }
   0x6   :  { %s1842_s22 = smov [#allocation2]   ;;  %s41_s26 = sshll.u32 %s1934_s2, 4  ;;  %s42_s26 = int_to_ptr.hbm [resolvable:$true] %s41_s26 }
   0x7   :  { %s17_s23 = sshll.u32 %s1842_s22, 4  ;;  %s1843_s1 = smov [#allocation7]   ;;  %s18_s23 = int_to_ptr.vmem [resolvable:$true] %s17_s23 }
   0x8   :  { %23 = dma.hbm_to_vmem [thread:$0]  %s16_s19, 128, %s18_s23, [#allocation3], %s1840_s20, %s1840_s20, %s1841_s21  }
   0x9   :  { %s43_s27 = sshll.u32 %s1843_s1, 4  ;;  %s1844_s28 = smov 16   ;;  %s44_s27 = int_to_ptr.vmem [resolvable:$true] %s43_s27 }
   0xa   :  { %s1845_s29 = smov 1  }
   0xb   :  { %49 = dma.hbm_to_vmem [thread:$0]  %s42_s26, 64, %s44_s27, [#allocation6], %s1844_s28, %s1844_s28, %s1845_s29  }
   0xc   :  { %1833 = dma.done.wait [#allocation3], 128  }
   0xd   :  { %1834 = vsyncadd [#allocation3], 4294967168 }
   0xe   :  { %1835 = dma.done.wait [#allocation6], 12352  }
   0xf   :  { %1836 = vsyncadd [#allocation6], 4294954944  ;;  %v66_v0 = vlaneseq  ;;  %v1633_v1 = vld [vmem:[#allocation5 + $0x38] sm:$0xff]  ;;  %v1632_v5 = vld [vmem:[#allocation5 + $0x30] sm:$0xff]  ;;  %v1846_v27 = vmov 0.0   ;;  %s1847_s0 = smov [#allocation8]  }
  0x10   :  { %v1641_v2 = vld [vmem:[#allocation5 + $0x78] sm:$0xff]  ;;  %337 = vmatpush.bf16.msra.mxu0 %v1633_v1  ;;  %v1640_v6 = vld [vmem:[#allocation5 + $0x70] sm:$0xff]  ;;  %v1631_v9 = vld [vmem:[#allocation5 + $0x28] sm:$0xff]  ;;  %s1219_s2 = sshll.u32 %s1847_s0, 4  ;;  %s1221_s5 = sshll.u32 %s1935_s3, 4  ;;  %s1220_s2 = int_to_ptr.vmem [resolvable:$true] %s1219_s2  ;;  %s1222_s5 = int_to_ptr.hbm [resolvable:$true] %s1221_s5 }
  0x11   :  { %v1649_v3 = vld [vmem:[#allocation5 + $0xb8] sm:$0xff]  ;;  %v1879_v4 = vshrl.u32 %v66_v0, 7  ;;  %351 = vmatpush.bf16.msra.mxu1 %v1641_v2  ;;  %v1648_v7 = vld [vmem:[#allocation5 + $0xb0] sm:$0xff]  ;;  %v1639_v10 = vld [vmem:[#allocation5 + $0x68] sm:$0xff]  ;;  %s1848_s6 = smov 128   ;;  %s1849_s7 = smov 8  }
  0x12   :  { %365 = vmatpush.bf16.msra.mxu2 %v1649_v3  ;;  %v1647_v12 = vld [vmem:[#allocation5 + $0xa8] sm:$0xff]  ;;  %v62_v13 = vld [vmem:[#allocation2] sm:$0xff]   ;;  %v1630_v15 = vld [vmem:[#allocation5 + $0x20] sm:$0xff] }
  0x13   :  { %v68_v8 = vadd.s32 8, %v1879_v4  ;;  %v73_v11 = vand.u32 15, %v1879_v4  ;;  %v1638_v16 = vld [vmem:[#allocation5 + $0x60] sm:$0xff]  ;;  %v64_v17 = vunpack.c.l.bf16 %v62_v13  ;;  %v65_v18 = vunpack.c.h.bf16 %v62_v13  ;;  %v1657_v19 = vld [vmem:[#allocation5 + $0xf8] sm:$0xff]  ;;  %v1628_v34 = vld [vmem:[#allocation5 + $0x10] sm:$0xff] }
  0x14   :  { %338 = vmatpush.bf16.msra.mxu0 %v1632_v5  ;;  %vm107_vm0 = vcmp.lt.s32.totalorder %v1879_v4, 1  ;;  %v1646_v20 = vld [vmem:[#allocation5 + $0xa0] sm:$0xff]  ;;  %615 = vmatpush.bf16.msra.mxu3 %v1657_v19  ;;  %vm114_vm3 = vcmp.lt.s32.totalorder %v1879_v4, 7  ;;  %v1629_v25 = vld [vmem:[#allocation5 + $0x18] sm:$0xff]  ;;  %v1636_v35 = vld [vmem:[#allocation5 + $0x50] sm:$0xff] }
  0x15   :  { %352 = vmatpush.bf16.msra.mxu1 %v1640_v6  ;;  %v80_v14 = vand.u32 15, %v68_v8  ;;  %vm93_vm1 = vcmp.ne.s32.totalorder %v73_v11, 0  ;;  %v105_v21 = vrot.slane %v64_v17, 7  ;;  %v106_v22 = vrot.slane %v65_v18, 7  ;;  %v1637_v26 = vld [vmem:[#allocation5 + $0x58] sm:$0xff]  ;;  %v1644_v38 = vld [vmem:[#allocation5 + $0x90] sm:$0xff] }
  0x16   :  { %366 = vmatpush.bf16.msra.mxu2 %v1648_v7  ;;  %v112_v23 = vrot.slane %v64_v17, 1  ;;  %v113_v24 = vrot.slane %v65_v18, 1  ;;  %v1885_v28 = vsel %vm93_vm1, 1.0, %v1846_v27  ;;  %v1645_v30 = vld [vmem:[#allocation5 + $0x98] sm:$0xff]  ;;  %v1627_v42 = vld [vmem:[#allocation5 + $0x8] sm:$0xff]  ;;  %v1626_v49 = vld [vmem:[#allocation5] sm:$0xff] }
  0x17   :  { %vm100_vm2 = vcmp.ne.s32.totalorder %v80_v14, 15  ;;  %v109_v29 = vsel %vm107_vm0, %v106_v22, %v105_v21  ;;  %v108_v36 = vsel %vm107_vm0, %v105_v21, %v106_v22  ;;  %v1635_v43 = vld [vmem:[#allocation5 + $0x48] sm:$0xff]  ;;  %v1634_v50 = vld [vmem:[#allocation5 + $0x40] sm:$0xff]  ;;  %v1665_v54 = vld [vmem:[#allocation5 + $0x138] sm:$0xff] }
  0x18   :  { %339 = vmatpush.bf16.msra.mxu0 %v1631_v9  ;;  %v1889_v31 = vsel %vm100_vm2, 1.0, %v1846_v27  ;;  %v116_v32 = vsel %vm114_vm3, %v113_v24, %v112_v23  ;;  %v110_v33 = vmul.f32 %v1885_v28, %v109_v29  ;;  %v115_v39 = vsel %vm114_vm3, %v112_v23, %v113_v24  ;;  %v1643_v46 = vld [vmem:[#allocation5 + $0x88] sm:$0xff]  ;;  %v1642_v53 = vld [vmem:[#allocation5 + $0x80] sm:$0xff]  ;;  %v1673_v55 = vld [vmem:[#allocation5 + $0x178] sm:$0xff] }
  0x19   :  { %353 = vmatpush.bf16.msra.mxu1 %v1639_v10  ;;  %v118_v37 = vmul.f32 %v1889_v31, %v116_v32  ;;  %v120_v41 = vpack.c.bf16 %v108_v36, %v108_v36  ;;  %v121_v44 = vpack.c.bf16 %v115_v39, %v115_v39  ;;  %v1625_v57 = vld [vmem:[#allocation2] sm:$0xff]  ;;  %v1664_v59 = vld [vmem:[#allocation5 + $0x130] sm:$0xff]  ;;  %v1663_v60 = vld [vmem:[#allocation5 + $0x128] sm:$0xff] }
  0x1a   :  { %367 = vmatpush.bf16.msra.mxu2 %v1647_v12  ;;  %v119_v40 = vpack.c.bf16 %v110_v33, %v110_v33  ;;  %v1656_v61 = vld [vmem:[#allocation5 + $0xf0] sm:$0xff]  ;;  %v1662_v63 = vld [vmem:[#allocation5 + $0x120] sm:$0xff]  ;;  %v1655_v0 = vld [vmem:[#allocation5 + $0xe8] sm:$0xff] }
  0x1b   :  { %v122_v45 = vpack.c.bf16 %v118_v37, %v118_v37  ;;  %v126_v48 = vunpack.c.l.b16 %v120_v41  ;;  %v137_v51 = vunpack.c.l.b16 %v121_v44  ;;  %v1672_v62 = vld [vmem:[#allocation5 + $0x170] sm:$0xff]  ;;  %616 = vmatpush.bf16.msra.mxu3 %v1656_v61  ;;  %v1671_v1 = vld [vmem:[#allocation5 + $0x168] sm:$0xff]  ;;  %v1661_v2 = vld [vmem:[#allocation5 + $0x118] sm:$0xff] }
  0x1c   :  { %340 = vmatpush.bf16.msra.mxu0 %v1630_v15  ;;  %v125_v47 = vunpack.c.l.b16 %v119_v40  ;;  %v1654_v3 = vld [vmem:[#allocation5 + $0xe0] sm:$0xff]  ;;  %v1660_v6 = vld [vmem:[#allocation5 + $0x110] sm:$0xff]  ;;  %v1653_v7 = vld [vmem:[#allocation5 + $0xd8] sm:$0xff] }
  0x1d   :  { %354 = vmatpush.bf16.msra.mxu1 %v1638_v16  ;;  %v138_v52 = vunpack.c.l.b16 %v122_v45  ;;  %v1670_v5 = vld [vmem:[#allocation5 + $0x160] sm:$0xff]  ;;  %v1669_v8 = vld [vmem:[#allocation5 + $0x158] sm:$0xff]  ;;  %v1659_v9 = vld [vmem:[#allocation5 + $0x108] sm:$0xff] }
  0x1e   :  { %368 = vmatpush.bf16.msra.mxu2 %v1646_v20  ;;  %v127_v56 = vpack.c.b16 %v126_v48, %v125_v47  ;;  %v1652_v10 = vld [vmem:[#allocation5 + $0xd0] sm:$0xff]  ;;  %v1658_v12 = vld [vmem:[#allocation5 + $0x100] sm:$0xff]  ;;  %v1651_v13 = vld [vmem:[#allocation5 + $0xc8] sm:$0xff] }
  0x1f   :  { %v139_v58 = vpack.c.b16 %v138_v52, %v137_v51  ;;  %617 = vmatpush.bf16.msra.mxu3 %v1655_v0  ;;  %v1668_v11 = vld [vmem:[#allocation5 + $0x150] sm:$0xff]  ;;  %v1667_v14 = vld [vmem:[#allocation5 + $0x148] sm:$0xff]  ;;  %v1650_v15 = vld [vmem:[#allocation5 + $0xc0] sm:$0xff] }
  0x20   :  { %341 = vmatpush.bf16.msra.mxu0 %v1629_v25  ;;  %v1666_v16 = vld [vmem:[#allocation5 + $0x140] sm:$0xff]  ;;  %v1681_v61 = vld [vmem:[#allocation5 + $0x1b8] sm:$0xff]  ;;  %v1680_v0 = vld [vmem:[#allocation5 + $0x1b0] sm:$0xff] }
  0x21   :  { %355 = vmatpush.bf16.msra.mxu1 %v1637_v26  ;;  %v1733_v17 = vld [vmem:[#allocation7] ss:$0 sm:$0xff] }
  0x22   :  { %369 = vmatpush.bf16.msra.mxu2 %v1645_v30 }
  0x23   :  { %618 = vmatpush.bf16.msra.mxu3 %v1654_v3  ;;  %v1679_v3 = vld [vmem:[#allocation5 + $0x1a8] sm:$0xff] }
  0x24   :  { %342 = vmatpush.bf16.msra.mxu0 %v1628_v34 }
  0x25   :  { %356 = vmatpush.bf16.msra.mxu1 %v1636_v35 }
  0x26   :  { %370 = vmatpush.bf16.msra.mxu2 %v1644_v38 }
  0x27   :  { %619 = vmatpush.bf16.msra.mxu3 %v1653_v7  ;;  %v1678_v7 = vld [vmem:[#allocation5 + $0x1a0] sm:$0xff] }
  0x28   :  { %343 = vmatpush.bf16.msra.mxu0 %v1627_v42 }
  0x29   :  { %357 = vmatpush.bf16.msra.mxu1 %v1635_v43 }
  0x2a   :  { %371 = vmatpush.bf16.msra.mxu2 %v1643_v46 }
  0x2b   :  { %620 = vmatpush.bf16.msra.mxu3 %v1652_v10  ;;  %v1677_v10 = vld [vmem:[#allocation5 + $0x198] sm:$0xff] }
  0x2c   :  { %344 = vmatpush.bf16.msra.mxu0 %v1626_v49 }
  0x2d   :  { %358 = vmatpush.bf16.msra.mxu1 %v1634_v50 }
  0x2e   :  { %372 = vmatpush.bf16.msra.mxu2 %v1642_v53 }
  0x2f   :  { %345 = vmatmul.bf16.vlgmr.msra.gmra.mxu0 %v127_v56  ;;  %621 = vmatpush.bf16.msra.mxu3 %v1651_v13  ;;  %v1676_v13 = vld [vmem:[#allocation5 + $0x190] sm:$0xff] }
  0x30   :  { %629 = vmatpush.bf16.msrb.mxu0 %v1665_v54  ;;  %359 = vmatmul.bf16.vlgmr.msra.gmra.mxu1 %v1625_v57 }
  0x31   :  { %643 = vmatpush.bf16.msrb.mxu1 %v1673_v55  ;;  %373 = vmatmul.bf16.vlgmr.msra.gmra.mxu2 %v139_v58 }
  0x32   :  { %893 = vmatpush.bf16.msrb.mxu2 %v1681_v61 }
  0x33   :  { %622 = vmatpush.bf16.msra.mxu3 %v1650_v15  ;;  %v1682_v15 = vld [vmem:[#allocation5 + $0x1c0] sm:$0xff] }
  0x34   :  { %630 = vmatpush.bf16.msrb.mxu0 %v1664_v59  ;;  %v1689_v59 = vld [vmem:[#allocation5 + $0x1f8] sm:$0xff] }
  0x35   :  { %644 = vmatpush.bf16.msrb.mxu1 %v1672_v62  ;;  %v1697_v62 = vld [vmem:[#allocation5 + $0x238] sm:$0xff] }
  0x36   :  { %894 = vmatpush.bf16.msrb.mxu2 %v1680_v0  ;;  %v1705_v0 = vld [vmem:[#allocation5 + $0x278] sm:$0xff] }
  0x37   :  { %907 = vmatpush.bf16.msrb.mxu3 %v1689_v59 }
  0x38   :  { %631 = vmatpush.bf16.msrb.mxu0 %v1663_v60  ;;  %v1688_v60 = vld [vmem:[#allocation5 + $0x1f0] sm:$0xff] }
  0x39   :  { %645 = vmatpush.bf16.msrb.mxu1 %v1671_v1  ;;  %v1696_v1 = vld [vmem:[#allocation5 + $0x230] sm:$0xff] }
  0x3a   :  { %895 = vmatpush.bf16.msrb.mxu2 %v1679_v3  ;;  %v1704_v3 = vld [vmem:[#allocation5 + $0x270] sm:$0xff] }
  0x3b   :  { %908 = vmatpush.bf16.msrb.mxu3 %v1688_v60 }
  0x3c   :  { %632 = vmatpush.bf16.msrb.mxu0 %v1662_v63  ;;  %v1687_v63 = vld [vmem:[#allocation5 + $0x1e8] sm:$0xff] }
  0x3d   :  { %646 = vmatpush.bf16.msrb.mxu1 %v1670_v5  ;;  %v1695_v5 = vld [vmem:[#allocation5 + $0x228] sm:$0xff] }
  0x3e   :  { %896 = vmatpush.bf16.msrb.mxu2 %v1678_v7  ;;  %v1703_v7 = vld [vmem:[#allocation5 + $0x268] sm:$0xff] }
  0x3f   :  { %909 = vmatpush.bf16.msrb.mxu3 %v1687_v63  ;;  %v1712_v63 = vld [vmem:[#allocation5 + $0x2b0] sm:$0xff] }
  0x40   :  { %633 = vmatpush.bf16.msrb.mxu0 %v1661_v2  ;;  %v1686_v2 = vld [vmem:[#allocation5 + $0x1e0] sm:$0xff] }
  0x41   :  { %647 = vmatpush.bf16.msrb.mxu1 %v1669_v8  ;;  %v1694_v8 = vld [vmem:[#allocation5 + $0x220] sm:$0xff] }
  0x42   :  { %897 = vmatpush.bf16.msrb.mxu2 %v1677_v10  ;;  %v1702_v10 = vld [vmem:[#allocation5 + $0x260] sm:$0xff] }
  0x43   :  { %910 = vmatpush.bf16.msrb.mxu3 %v1686_v2  ;;  %v1711_v2 = vld [vmem:[#allocation5 + $0x2a8] sm:$0xff] }
  0x44   :  { %634 = vmatpush.bf16.msrb.mxu0 %v1660_v6  ;;  %v1685_v6 = vld [vmem:[#allocation5 + $0x1d8] sm:$0xff] }
  0x45   :  { %648 = vmatpush.bf16.msrb.mxu1 %v1668_v11  ;;  %v1693_v11 = vld [vmem:[#allocation5 + $0x218] sm:$0xff] }
  0x46   :  { %898 = vmatpush.bf16.msrb.mxu2 %v1676_v13  ;;  %v1701_v13 = vld [vmem:[#allocation5 + $0x258] sm:$0xff] }
  0x47   :  { %911 = vmatpush.bf16.msrb.mxu3 %v1685_v6  ;;  %v1710_v6 = vld [vmem:[#allocation5 + $0x2a0] sm:$0xff] }
  0x48   :  { %635 = vmatpush.bf16.msrb.mxu0 %v1659_v9  ;;  %v1684_v9 = vld [vmem:[#allocation5 + $0x1d0] sm:$0xff] }
  0x49   :  { %649 = vmatpush.bf16.msrb.mxu1 %v1667_v14  ;;  %v1692_v14 = vld [vmem:[#allocation5 + $0x210] sm:$0xff] }
  0x4b   :  { %912 = vmatpush.bf16.msrb.mxu3 %v1684_v9  ;;  %v1709_v9 = vld [vmem:[#allocation5 + $0x298] sm:$0xff] }
  0x4c   :  { %636 = vmatpush.bf16.msrb.mxu0 %v1658_v12  ;;  %v1683_v12 = vld [vmem:[#allocation5 + $0x1c8] sm:$0xff] }
  0x4d   :  { %650 = vmatpush.bf16.msrb.mxu1 %v1666_v16  ;;  %v1675_v16 = vld [vmem:[#allocation5 + $0x188] sm:$0xff] }
  0x4e   :  { %899 = vmatpush.bf16.msrb.mxu2 %v1675_v16  ;;  %v1700_v16 = vld [vmem:[#allocation5 + $0x250] sm:$0xff] }
  0x4f   :  { %913 = vmatpush.bf16.msrb.mxu3 %v1683_v12  ;;  %v1708_v12 = vld [vmem:[#allocation5 + $0x290] sm:$0xff] }
  0x50   :  { %921 = vmatpush.bf16.msra.mxu0 %v1697_v62 }
  0x51   :  { %1171 = vmatpush.bf16.msra.mxu1 %v1705_v0 }
  0x53   :  { %914 = vmatpush.bf16.msrb.mxu3 %v1682_v15  ;;  %v1707_v15 = vld [vmem:[#allocation5 + $0x288] sm:$0xff] }
  0x54   :  { %922 = vmatpush.bf16.msra.mxu0 %v1696_v1  ;;  %v1721_v1 = vld [vmem:[#allocation5 + $0x2f8] sm:$0xff] }
  0x55   :  { %1172 = vmatpush.bf16.msra.mxu1 %v1704_v3 }
  0x58   :  { %923 = vmatpush.bf16.msra.mxu0 %v1695_v5  ;;  %v1720_v5 = vld [vmem:[#allocation5 + $0x2f0] sm:$0xff] }
  0x59   :  { %1173 = vmatpush.bf16.msra.mxu1 %v1703_v7 }
  0x5c   :  { %924 = vmatpush.bf16.msra.mxu0 %v1694_v8  ;;  %v1719_v8 = vld [vmem:[#allocation5 + $0x2e8] sm:$0xff] }
  0x5d   :  { %1174 = vmatpush.bf16.msra.mxu1 %v1702_v10 }
  0x60   :  { %925 = vmatpush.bf16.msra.mxu0 %v1693_v11  ;;  %v1718_v11 = vld [vmem:[#allocation5 + $0x2e0] sm:$0xff] }
  0x61   :  { %1175 = vmatpush.bf16.msra.mxu1 %v1701_v13 }
  0x64   :  { %926 = vmatpush.bf16.msra.mxu0 %v1692_v14  ;;  %v1717_v14 = vld [vmem:[#allocation5 + $0x2d8] sm:$0xff] }
  0x65   :  { %1176 = vmatpush.bf16.msra.mxu1 %v1700_v16 }
  0xac   :  { %v346_v18 = vpop.f32.mrf.mxu0 }
  0xad   :  { %v347_v19 = vadd.f32 %v1733_v17, %v346_v18  ;;  %v360_v20 = vpop.f32.mrf.mxu1  ;;  %v1674_v18 = vld [vmem:[#allocation5 + $0x180] sm:$0xff] }
  0xae   :  { %900 = vmatpush.bf16.msrb.mxu2 %v1674_v18  ;;  %v1706_v18 = vld [vmem:[#allocation5 + $0x280] sm:$0xff] }
  0xaf   :  { %v361_v21 = vadd.f32 %v360_v20, %v347_v19  ;;  %v1690_v19 = vld [vmem:[#allocation5 + $0x200] sm:$0xff] }
  0xb0   :  { %v1734_v20 = vld [vmem:[#allocation7 + $0x1] ss:$0 sm:$0xff] }
  0xb4   :  { %v374_v22 = vpop.f32.mrf.mxu2  ;;  %v348_v23 = vpop.f32.mrf.mxu0 }
  0xb5   :  { %v375_v24 = vadd.f32 %v374_v22, %v361_v21  ;;  %v349_v25 = vadd.f32 %v1733_v17, %v348_v23  ;;  %v362_v27 = vpop.f32.mrf.mxu1  ;;  %v1691_v17 = vld [vmem:[#allocation5 + $0x208] sm:$0xff]  ;;  %v1713_v21 = vld [vmem:[#allocation5 + $0x2b8] sm:$0xff] }
  0xb6   :  { %927 = vmatpush.bf16.msra.mxu0 %v1691_v17  ;;  %1185 = vmatpush.bf16.msra.mxu2 %v1713_v21  ;;  %v1716_v17 = vld [vmem:[#allocation5 + $0x2d0] sm:$0xff]  ;;  %v1698_v21 = vld [vmem:[#allocation5 + $0x240] sm:$0xff] }
  0xb7   :  { %v379_v26 = vmax.f32 %v375_v24, 0.0  ;;  %v363_v29 = vadd.f32 %v362_v27, %v349_v25 }
  0xb9   :  { %v395_v33 = vpack.c.bf16 %v379_v26, %v379_v26  ;;  %v381_v35 = vrot.slane %v379_v26, 7  ;;  %v387_v36 = vrot.slane %v379_v26, 1 }
  0xba   :  { %928 = vmatpush.bf16.msra.mxu0 %v1690_v19  ;;  %1186 = vmatpush.bf16.msra.mxu2 %v1712_v63  ;;  %v1699_v19 = vld [vmem:[#allocation5 + $0x248] sm:$0xff] }
  0xbb   :  { %v407_v40 = vunpack.c.l.b16 %v395_v33  ;;  %1177 = vmatpush.bf16.msra.mxu1 %v1699_v19 }
  0xbc   :  { %v376_v30 = vpop.f32.mrf.mxu2 }
  0xbd   :  { %v377_v32 = vadd.f32 %v376_v30, %v363_v29 }
  0xbe   :  { %1187 = vmatpush.bf16.msra.mxu2 %v1711_v2 }
  0xbf   :  { %v380_v34 = vmax.f32 %v377_v32, 0.0  ;;  %1178 = vmatpush.bf16.msra.mxu1 %v1698_v21 }
  0xc1   :  { %v382_v37 = vrot.slane %v380_v34, 7  ;;  %v388_v38 = vrot.slane %v380_v34, 1  ;;  %v396_v39 = vpack.c.bf16 %v380_v34, %v380_v34 }
  0xc2   :  { %1188 = vmatpush.bf16.msra.mxu2 %v1710_v6 }
  0xc3   :  { %v408_v41 = vunpack.c.l.b16 %v396_v39  ;;  %v383_v42 = vsel %vm107_vm0, %v381_v35, %v382_v37  ;;  %v384_v43 = vsel %vm107_vm0, %v382_v37, %v381_v35  ;;  %v389_v44 = vsel %vm114_vm3, %v387_v36, %v388_v38 }
  0xc4   :  { %v385_v45 = vmul.f32 %v1885_v28, %v384_v43  ;;  %v394_v46 = vpack.c.bf16 %v383_v42, %v383_v42  ;;  %v390_v47 = vsel %vm114_vm3, %v388_v38, %v387_v36  ;;  %v397_v50 = vpack.c.bf16 %v389_v44, %v389_v44 }
  0xc5   :  { %v409_v48 = vpack.c.b16 %v408_v41, %v407_v40  ;;  %v392_v49 = vmul.f32 %v1889_v31, %v390_v47 }
  0xc6   :  { %v393_v51 = vpack.c.bf16 %v385_v45, %v385_v45  ;;  %v402_v54 = vunpack.c.l.b16 %v394_v46  ;;  %v413_v55 = vunpack.c.l.b16 %v397_v50  ;;  %1189 = vmatpush.bf16.msra.mxu2 %v1709_v9 }
  0xc7   :  { %637 = vmatmul.bf16.vlgmr.msrb.gmra.mxu0 %v409_v48  ;;  %v398_v52 = vpack.c.bf16 %v392_v49, %v392_v49 }
  0xc8   :  { %v401_v53 = vunpack.c.l.b16 %v393_v51 }
  0xc9   :  { %v414_v56 = vunpack.c.l.b16 %v398_v52 }
  0xca   :  { %v403_v57 = vpack.c.b16 %v402_v54, %v401_v53  ;;  %1190 = vmatpush.bf16.msra.mxu2 %v1708_v12 }
  0xcb   :  { %v415_v58 = vpack.c.b16 %v414_v56, %v413_v55 }
  0xcc   :  { %623 = vmatmul.bf16.vlgmr.msra.gmra.mxu3 %v403_v57 }
  0xcd   :  { %651 = vmatmul.bf16.vlgmr.msrb.gmra.mxu1 %v415_v58  ;;  %1199 = vmatpush.bf16.msra.mxu3 %v1721_v1 }
  0xce   :  { %1191 = vmatpush.bf16.msra.mxu2 %v1707_v15 }
  0xd1   :  { %1200 = vmatpush.bf16.msra.mxu3 %v1720_v5 }
  0xd2   :  { %1192 = vmatpush.bf16.msra.mxu2 %v1706_v18 }
  0xd5   :  { %1201 = vmatpush.bf16.msra.mxu3 %v1719_v8 }
  0xd9   :  { %1202 = vmatpush.bf16.msra.mxu3 %v1718_v11 }
  0xdd   :  { %1203 = vmatpush.bf16.msra.mxu3 %v1717_v14 }
  0xe1   :  { %1204 = vmatpush.bf16.msra.mxu3 %v1716_v17 }
 0x144   :  { %v638_v22 = vpop.f32.mrf.mxu0 }
 0x14a   :  { %v652_v25 = vpop.f32.mrf.mxu1 }
 0x14c   :  { %v640_v32 = vpop.f32.mrf.mxu0 }
 0x14f   :  { %v624_v23 = vpop.f32.mrf.mxu3 }
 0x150   :  { %v625_v24 = vadd.f32 %v1734_v20, %v624_v23  ;;  %v1735_v23 = vld [vmem:[#allocation7 + $0x2] ss:$0 sm:$0xff] }
 0x152   :  { %v639_v26 = vadd.f32 %v638_v22, %v625_v24  ;;  %v654_v35 = vpop.f32.mrf.mxu1  ;;  %v1714_v22 = vld [vmem:[#allocation5 + $0x2c0] sm:$0xff] }
 0x154   :  { %v653_v27 = vadd.f32 %v652_v25, %v639_v26 }
 0x156   :  { %v657_v33 = vmax.f32 %v653_v27, 0.0 }
 0x157   :  { %v626_v29 = vpop.f32.mrf.mxu3 }
 0x158   :  { %v627_v30 = vadd.f32 %v1734_v20, %v626_v29  ;;  %v673_v37 = vpack.c.bf16 %v657_v33, %v657_v33  ;;  %v659_v39 = vrot.slane %v657_v33, 7  ;;  %v665_v40 = vrot.slane %v657_v33, 1  ;;  %v1715_v20 = vld [vmem:[#allocation5 + $0x2c8] sm:$0xff] }
 0x159   :  { %1205 = vmatpush.bf16.msra.mxu3 %v1715_v20 }
 0x15a   :  { %v641_v34 = vadd.f32 %v640_v32, %v627_v30  ;;  %v685_v44 = vunpack.c.l.b16 %v673_v37 }
 0x15c   :  { %v655_v36 = vadd.f32 %v654_v35, %v641_v34 }
 0x15d   :  { %1206 = vmatpush.bf16.msra.mxu3 %v1714_v22 }
 0x15e   :  { %v658_v38 = vmax.f32 %v655_v36, 0.0 }
 0x160   :  { %v660_v41 = vrot.slane %v658_v38, 7  ;;  %v666_v42 = vrot.slane %v658_v38, 1  ;;  %v674_v43 = vpack.c.bf16 %v658_v38, %v658_v38 }
 0x162   :  { %v686_v45 = vunpack.c.l.b16 %v674_v43  ;;  %v661_v46 = vsel %vm107_vm0, %v659_v39, %v660_v41  ;;  %v662_v47 = vsel %vm107_vm0, %v660_v41, %v659_v39  ;;  %v667_v48 = vsel %vm114_vm3, %v665_v40, %v666_v42 }
 0x163   :  { %v663_v49 = vmul.f32 %v1885_v28, %v662_v47  ;;  %v672_v50 = vpack.c.bf16 %v661_v46, %v661_v46  ;;  %v668_v51 = vsel %vm114_vm3, %v666_v42, %v665_v40  ;;  %v675_v54 = vpack.c.bf16 %v667_v48, %v667_v48 }
 0x164   :  { %v687_v52 = vpack.c.b16 %v686_v45, %v685_v44  ;;  %v670_v53 = vmul.f32 %v1889_v31, %v668_v51 }
 0x165   :  { %v671_v55 = vpack.c.bf16 %v663_v49, %v663_v49  ;;  %v680_v58 = vunpack.c.l.b16 %v672_v50  ;;  %v691_v59 = vunpack.c.l.b16 %v675_v54 }
 0x166   :  { %915 = vmatmul.bf16.vlgmr.msrb.gmra.mxu3 %v687_v52  ;;  %v676_v56 = vpack.c.bf16 %v670_v53, %v670_v53 }
 0x167   :  { %v679_v57 = vunpack.c.l.b16 %v671_v55 }
 0x168   :  { %v692_v60 = vunpack.c.l.b16 %v676_v56 }
 0x169   :  { %v681_v61 = vpack.c.b16 %v680_v58, %v679_v57 }
 0x16a   :  { %v693_v62 = vpack.c.b16 %v692_v60, %v691_v59 }
 0x16b   :  { %901 = vmatmul.bf16.vlgmr.msrb.gmra.mxu2 %v681_v61 }
 0x16c   :  { %929 = vmatmul.bf16.vlgmr.msra.gmra.mxu0 %v693_v62 }
 0x1e9   :  { %v916_v24 = vpop.f32.mrf.mxu3  ;;  %v930_v27 = vpop.f32.mrf.mxu0 }
 0x1ee   :  { %v902_v25 = vpop.f32.mrf.mxu2 }
 0x1ef   :  { %v903_v26 = vadd.f32 %v1735_v23, %v902_v25 }
 0x1f1   :  { %v917_v29 = vadd.f32 %v916_v24, %v903_v26  ;;  %v918_v35 = vpop.f32.mrf.mxu3  ;;  %v932_v37 = vpop.f32.mrf.mxu0 }
 0x1f3   :  { %v931_v30 = vadd.f32 %v930_v27, %v917_v29 }
 0x1f5   :  { %v935_v34 = vmax.f32 %v931_v30, 0.0 }
 0x1f6   :  { %v904_v32 = vpop.f32.mrf.mxu2 }
 0x1f7   :  { %v905_v33 = vadd.f32 %v1735_v23, %v904_v32  ;;  %v951_v39 = vpack.c.bf16 %v935_v34, %v935_v34  ;;  %v937_v41 = vrot.slane %v935_v34, 7  ;;  %v943_v42 = vrot.slane %v935_v34, 1 }
 0x1f9   :  { %v919_v36 = vadd.f32 %v918_v35, %v905_v33  ;;  %v963_v46 = vunpack.c.l.b16 %v951_v39 }
 0x1fb   :  { %v933_v38 = vadd.f32 %v932_v37, %v919_v36 }
 0x1fd   :  { %v936_v40 = vmax.f32 %v933_v38, 0.0 }
 0x1ff   :  { %v938_v43 = vrot.slane %v936_v40, 7  ;;  %v944_v44 = vrot.slane %v936_v40, 1  ;;  %v952_v45 = vpack.c.bf16 %v936_v40, %v936_v40 }
 0x201   :  { %v964_v47 = vunpack.c.l.b16 %v952_v45  ;;  %v939_v48 = vsel %vm107_vm0, %v937_v41, %v938_v43  ;;  %v940_v49 = vsel %vm107_vm0, %v938_v43, %v937_v41  ;;  %v945_v50 = vsel %vm114_vm3, %v943_v42, %v944_v44 }
 0x202   :  { %v941_v51 = vmul.f32 %v1885_v28, %v940_v49  ;;  %v950_v52 = vpack.c.bf16 %v939_v48, %v939_v48  ;;  %v946_v53 = vsel %vm114_vm3, %v944_v44, %v943_v42  ;;  %v953_v56 = vpack.c.bf16 %v945_v50, %v945_v50  ;;  %v1736_v28 = vld [vmem:[#allocation7 + $0x3] ss:$0 sm:$0xff] }
 0x203   :  { %v965_v54 = vpack.c.b16 %v964_v47, %v963_v46  ;;  %v948_v55 = vmul.f32 %v1889_v31, %v946_v53 }
 0x204   :  { %v949_v57 = vpack.c.bf16 %v941_v51, %v941_v51  ;;  %v958_v60 = vunpack.c.l.b16 %v950_v52  ;;  %v969_v61 = vunpack.c.l.b16 %v953_v56 }
 0x205   :  { %1193 = vmatmul.bf16.vlgmr.msra.gmra.mxu2 %v965_v54  ;;  %v954_v58 = vpack.c.bf16 %v948_v55, %v948_v55 }
 0x206   :  { %v957_v59 = vunpack.c.l.b16 %v949_v57 }
 0x207   :  { %v970_v62 = vunpack.c.l.b16 %v954_v58 }
 0x208   :  { %v959_v63 = vpack.c.b16 %v958_v60, %v957_v59 }
 0x209   :  { %v971_v0 = vpack.c.b16 %v970_v62, %v969_v61 }
 0x20a   :  { %1179 = vmatmul.bf16.vlgmr.msra.gmra.mxu1 %v959_v63 }
 0x20b   :  { %1207 = vmatmul.bf16.vlgmr.msra.gmra.mxu3 %v971_v0 }
 0x287   :  { %v1180_v1 = vpop.f32.mrf.mxu1 }
 0x288   :  { %v1194_v2 = vpop.f32.mrf.mxu2  ;;  %v1181_v4 = vadd.f32 %v1736_v28, %v1180_v1 }
 0x28a   :  { %v1195_v3 = vadd.f32 %v1194_v2, %v1181_v4 }
 0x28e   :  { %v1208_v5 = vpop.f32.mrf.mxu3 }
 0x28f   :  { %v1209_v6 = vadd.f32 %v1208_v5, %v1195_v3  ;;  %v1182_v31 = vpop.f32.mrf.mxu1 }
 0x290   :  { %v1183_v7 = vadd.f32 %v1736_v28, %v1182_v31  ;;  %v1196_v8 = vpop.f32.mrf.mxu2 }
 0x291   :  { %1213 = vst [vmem:[#allocation8] sm:$0xff] %v1209_v6 }
 0x292   :  { %v1197_v9 = vadd.f32 %v1196_v8, %v1183_v7 }
 0x296   :  { %v1210_v10 = vpop.f32.mrf.mxu3 }
 0x297   :  { %v1211_v11 = vadd.f32 %v1210_v10, %v1197_v9 }
 0x299   :  { %1214 = vst [vmem:[#allocation8 + $0x8] sm:$0xff] %v1211_v11 }
 0x29a   :  { %1227 = dma.vmem_to_hbm [thread:$0]  %s1220_s2, 256, %s1222_s5, [#allocation4], %s1848_s6, %s1848_s6, %s1849_s7  }
 0x29b   :  { %1837 = dma.done.wait [#allocation4], 256  }
 0x29c   :  { %1838 = vsyncadd [#allocation4], 4294967040 }
 0x29d   :  { %1232 = vsyncpa [#allocation3], 1 }
 0x29e   :  { %1233 = vsyncpa [#allocation6], 1 }
 0x29f   :  { %1234 = vsyncpa [#allocation4], 1 }

</bundles_post_ra>
